<compile_context>
chip_gen: v7x
topology: tpu7x:2x2x1
jax: 0.10.0
libtpu: 0.0.40
codegen_flags: <defaults>
</compile_context>

<pallas_src>
import jax
import jax.numpy as jnp
from jax.experimental import pallas as pl
from jax.experimental.pallas import tpu as pltpu

SEQUENCE_LENGTH = 200
H1 = 100
H2 = 50
OUT = 2
HPAD = 128   # lane-dense padded width for the two hidden layers
OUT_PAD = 8  # narrow padded width for the logits (block dim == full array dim is legal)


def _round_up(x, m):
    return ((x + m - 1) // m) * m


def dnanet_kernel(x_ref, w1_ref, b1_ref, w2_ref, b2_ref, w3_ref, b3_ref, o_ref):
    # Whole 3-layer MLP for one batch tile.  Matmuls run on the MXU with bf16
    # operands and f32 accumulation; the f32->bf16 cast of x and the bias-add /
    # ReLU run on the VPU and hide under the (dominant) x DMA.
    x = x_ref[...].astype(jnp.bfloat16)                               # [tb, 200]
    h1 = jnp.dot(x, w1_ref[...], preferred_element_type=jnp.float32) + b1_ref[...]
    h1 = jnp.maximum(h1, 0.0).astype(jnp.bfloat16)                    # relu(fc1) [tb, 128]
    h2 = jnp.dot(h1, w2_ref[...], preferred_element_type=jnp.float32) + b2_ref[...]
    h2 = jnp.maximum(h2, 0.0).astype(jnp.bfloat16)                    # relu(fc2) [tb, 128]
    o = jnp.dot(h2, w3_ref[...], preferred_element_type=jnp.float32) + b3_ref[...]
    o_ref[...] = o.astype(o_ref.dtype)                                # fc3       [tb, 8]


def _pad_and_cast_params(params):
    """Zero-pad hidden dims to 128 / output to 8; weights -> bf16, biases stay f32."""
    w1, b1, w2, b2, w3, b3 = params

    def pad_w(w, rows, cols):
        out = jnp.zeros((rows, cols), jnp.float32)
        return out.at[: w.shape[0], : w.shape[1]].set(w).astype(jnp.bfloat16)

    def pad_b(b, cols):
        out = jnp.zeros((1, cols), jnp.float32)
        return out.at[:, : b.shape[1]].set(b)

    w1p = pad_w(w1, SEQUENCE_LENGTH, HPAD)
    w2p = pad_w(w2, HPAD, HPAD)
    w3p = pad_w(w3, HPAD, OUT_PAD)
    return w1p, pad_b(b1, HPAD), w2p, pad_b(b2, HPAD), w3p, pad_b(b3, OUT_PAD)


def _choose_grid(B, tile_b):
    """Near-equal batch tiles (multiple of 16 rows) with a partial last block.

    Avoids the old round-up-to-a-full-tile batch padding (up to ~2x wasted DMA for
    ragged batches) and guarantees >= 2 grid steps for batches >= 32 rows so the
    "parallel" axis can shard across v7x's two TensorCores.
    """
    n_steps = pl.cdiv(B, tile_b)
    if B >= 32:
        n_steps = max(n_steps, 2)
    tb = _round_up(pl.cdiv(B, n_steps), 16)
    tb = min(tb, _round_up(B, 16))
    return tb, pl.cdiv(B, tb)


def dnanet_forward(x, params, *, tile_b=2048):
    """x: [B, 200] float32. Returns logits [B, 2] float32."""
    B = x.shape[0]
    tb, n_steps = _choose_grid(B, tile_b)

    w1p, b1p, w2p, b2p, w3p, b3p = _pad_and_cast_params(params)

    # Weight/bias blocks are the full (small) arrays, reused by every grid step.
    full = lambda shape: pl.BlockSpec(shape, lambda i: (0, 0))

    flops = 2 * B * (SEQUENCE_LENGTH * HPAD + HPAD * HPAD + HPAD * OUT_PAD)
    bytes_accessed = (
        x.size * 4                                   # f32 x streamed once
        + B * OUT_PAD * 4                            # narrow f32 logits
        + (w1p.size + w2p.size + w3p.size) * 2       # bf16 weights
        + (b1p.size + b2p.size + b3p.size) * 4       # f32 biases
    )

    out_padded = pl.pallas_call(
        dnanet_kernel,
        out_shape=jax.ShapeDtypeStruct((B, OUT_PAD), jnp.float32),
        grid=(n_steps,),
        in_specs=[
            pl.BlockSpec((tb, SEQUENCE_LENGTH), lambda i: (i, 0)),  # x tile (f32)
            full((SEQUENCE_LENGTH, HPAD)),  # w1
            full((1, HPAD)),                # b1
            full((HPAD, HPAD)),             # w2
            full((1, HPAD)),                # b2
            full((HPAD, OUT_PAD)),          # w3
            full((1, OUT_PAD)),             # b3
        ],
        out_specs=pl.BlockSpec((tb, OUT_PAD), lambda i: (i, 0)),
        compiler_params=pltpu.CompilerParams(
            dimension_semantics=("parallel",),
        ),
        cost_estimate=pl.CostEstimate(
            flops=flops, transcendentals=0, bytes_accessed=bytes_accessed
        ),
    )(x, w1p, b1p, w2p, b2p, w3p, b3p)

    # Drop the 6 zero pad columns (tiny B x 8 slice; no batch padding to drop).
    return out_padded[:, :OUT]


def init_params(key):
    """Deterministic init mimicking PyTorch nn.Linear default (U[-1/sqrt(fan_in), +1/sqrt(fan_in)]).

    Weights are stored transposed relative to PyTorch, i.e. [in, out], so each
    layer is a plain `x @ W + b` on the MXU inside the kernel.
    """
    ks = jax.random.split(key, 6)

    def linear(kw, kb, fan_in, fan_out):
        bound = 1.0 / jnp.sqrt(jnp.float32(fan_in))
        w = jax.random.uniform(kw, (fan_in, fan_out), jnp.float32, -bound, bound)
        b = jax.random.uniform(kb, (1, fan_out), jnp.float32, -bound, bound)
        return w, b

    w1, b1 = linear(ks[0], ks[1], SEQUENCE_LENGTH, H1)
    w2, b2 = linear(ks[2], ks[3], H1, H2)
    w3, b3 = linear(ks[4], ks[5], H2, OUT)
    return (w1, b1, w2, b2, w3, b3)


def dnanet_reference(x, params):
    """Pure-JAX reference mimicking the kernel's bf16-operand / f32-accumulate numerics."""
    w1, b1, w2, b2, w3, b3 = params
    bf = lambda a: a.astype(jnp.bfloat16).astype(jnp.float32)
    h1 = jnp.maximum(bf(x) @ bf(w1) + b1, 0.0)
    h2 = jnp.maximum(bf(h1) @ bf(w2) + b2, 0.0)
    return bf(h2) @ bf(w3) + b3


if __name__ == "__main__":
    key = jax.random.PRNGKey(0)
    k_params, k_x = jax.random.split(key)

    params = init_params(k_params)

    batch = 20  # deliberately ragged to exercise the partial last block
    x = jax.random.normal(k_x, (batch, SEQUENCE_LENGTH), jnp.float32)

    # Small tile here so the test runs a multi-step grid; production default is 2048.
    out = dnanet_forward(x, params, tile_b=8)
    out = jax.block_until_ready(out)

    ref = dnanet_reference(x, params)
    assert out.shape == (batch, OUT)
    assert jnp.allclose(out, ref, atol=1e-2, rtol=1e-2), "mismatch vs reference"

    print("KERNEL_OK")
</pallas_src>

<mosaic_0001>
module attributes {stable_mosaic.version = 11 : i64} {
  func.func @dnanet_kernel(%arg0: i32, %arg1: memref<16x200xf32, #tpu.memory_space<vmem>>, %arg2: memref<200x128xbf16, #tpu.memory_space<vmem>>, %arg3: memref<1x128xf32, #tpu.memory_space<vmem>>, %arg4: memref<128x128xbf16, #tpu.memory_space<vmem>>, %arg5: memref<1x128xf32, #tpu.memory_space<vmem>>, %arg6: memref<128x8xbf16, #tpu.memory_space<vmem>>, %arg7: memref<1x8xf32, #tpu.memory_space<vmem>>, %arg8: memref<16x8xf32, #tpu.memory_space<vmem>>) attributes {dimension_semantics = [#tpu.dimension_semantics<parallel>], iteration_bounds = array<i64: 2>, scalar_prefetch = 0 : i64, scratch_operands = 0 : i64, tpu.core_type = #tpu.core_type<tc>, window_params = [{transform_indices = @transform_0, window_bounds = array<i64: 16, 200>}, {pipeline_mode = #tpu.pipeline_mode<synchronous>, transform_indices = @transform_1, window_bounds = array<i64: 200, 128>}, {pipeline_mode = #tpu.pipeline_mode<synchronous>, transform_indices = @transform_2, window_bounds = array<i64: 1, 128>}, {pipeline_mode = #tpu.pipeline_mode<synchronous>, transform_indices = @transform_3, window_bounds = array<i64: 128, 128>}, {pipeline_mode = #tpu.pipeline_mode<synchronous>, transform_indices = @transform_4, window_bounds = array<i64: 1, 128>}, {pipeline_mode = #tpu.pipeline_mode<synchronous>, transform_indices = @transform_5, window_bounds = array<i64: 128, 8>}, {pipeline_mode = #tpu.pipeline_mode<synchronous>, transform_indices = @transform_6, window_bounds = array<i64: 1, 8>}, {transform_indices = @transform_7, window_bounds = array<i64: 16, 8>}]} {
    %c0 = arith.constant 0 : index
    %c0_0 = arith.constant 0 : index
    %0 = vector.load %arg1[%c0, %c0_0] : memref<16x200xf32, #tpu.memory_space<vmem>>, vector<16x200xf32>
    %1 = arith.truncf %0 : vector<16x200xf32> to vector<16x200xbf16>
    %c0_1 = arith.constant 0 : index
    %c0_2 = arith.constant 0 : index
    %2 = vector.load %arg2[%c0_1, %c0_2] : memref<200x128xbf16, #tpu.memory_space<vmem>>, vector<200x128xbf16>
    %cst = arith.constant dense<0.000000e+00> : vector<16x128xf32>
    %3 = tpu.matmul %1, %2, %cst {dimension_numbers = #tpu.dot_dimension_numbers<[1], [0], [0], [1], [0, 0, 1, 1], [], []>} : vector<16x200xbf16>, vector<200x128xbf16>, vector<16x128xf32> -> vector<16x128xf32>
    %c0_3 = arith.constant 0 : index
    %c0_4 = arith.constant 0 : index
    %4 = vector.load %arg3[%c0_3, %c0_4] : memref<1x128xf32, #tpu.memory_space<vmem>>, vector<1x128xf32>
    %5 = vector.broadcast %4 : vector<1x128xf32> to vector<16x128xf32>
    %6 = arith.addf %3, %5 : vector<16x128xf32>
    %cst_5 = arith.constant 0.000000e+00 : f32
    %7 = vector.broadcast %cst_5 : f32 to vector<16x128xf32>
    %8 = arith.maximumf %6, %7 : vector<16x128xf32>
    %9 = arith.truncf %8 : vector<16x128xf32> to vector<16x128xbf16>
    %c0_6 = arith.constant 0 : index
    %c0_7 = arith.constant 0 : index
    %10 = vector.load %arg4[%c0_6, %c0_7] : memref<128x128xbf16, #tpu.memory_space<vmem>>, vector<128x128xbf16>
    %cst_8 = arith.constant dense<0.000000e+00> : vector<16x128xf32>
    %11 = tpu.matmul %9, %10, %cst_8 {dimension_numbers = #tpu.dot_dimension_numbers<[1], [0], [0], [1], [0, 0, 1, 1], [], []>} : vector<16x128xbf16>, vector<128x128xbf16>, vector<16x128xf32> -> vector<16x128xf32>
    %c0_9 = arith.constant 0 : index
    %c0_10 = arith.constant 0 : index
    %12 = vector.load %arg5[%c0_9, %c0_10] : memref<1x128xf32, #tpu.memory_space<vmem>>, vector<1x128xf32>
    %13 = vector.broadcast %12 : vector<1x128xf32> to vector<16x128xf32>
    %14 = arith.addf %11, %13 : vector<16x128xf32>
    %cst_11 = arith.constant 0.000000e+00 : f32
    %15 = vector.broadcast %cst_11 : f32 to vector<16x128xf32>
    %16 = arith.maximumf %14, %15 : vector<16x128xf32>
    %17 = arith.truncf %16 : vector<16x128xf32> to vector<16x128xbf16>
    %c0_12 = arith.constant 0 : index
    %c0_13 = arith.constant 0 : index
    %18 = vector.load %arg6[%c0_12, %c0_13] : memref<128x8xbf16, #tpu.memory_space<vmem>>, vector<128x8xbf16>
    %cst_14 = arith.constant dense<0.000000e+00> : vector<16x8xf32>
    %19 = tpu.matmul %17, %18, %cst_14 {dimension_numbers = #tpu.dot_dimension_numbers<[1], [0], [0], [1], [0, 0, 1, 1], [], []>} : vector<16x128xbf16>, vector<128x8xbf16>, vector<16x8xf32> -> vector<16x8xf32>
    %c0_15 = arith.constant 0 : index
    %c0_16 = arith.constant 0 : index
    %20 = vector.load %arg7[%c0_15, %c0_16] : memref<1x8xf32, #tpu.memory_space<vmem>>, vector<1x8xf32>
    %21 = vector.broadcast %20 : vector<1x8xf32> to vector<16x8xf32>
    %22 = arith.addf %19, %21 : vector<16x8xf32>
    %c0_17 = arith.constant 0 : index
    %c0_18 = arith.constant 0 : index
    %23 = vector.load %arg8[%c0_17, %c0_18] : memref<16x8xf32, #tpu.memory_space<vmem>>, vector<16x8xf32>
    tpu.vector_store %arg8[%c0_17, %c0_18], %22 {strides = array<i32>} : memref<16x8xf32, #tpu.memory_space<vmem>>, vector<16x8xf32>,
    return
  }
  func.func @transform_0(%arg0: i32) -> (i32, i32) {
    %c0_i32 = arith.constant 0 : i32
    %c0_i32_0 = arith.constant 0 : i32
    return %arg0, %c0_i32 : i32, i32
  }
  func.func @transform_1(%arg0: i32) -> (i32, i32) {
    %c0_i32 = arith.constant 0 : i32
    %c0_i32_0 = arith.constant 0 : i32
    %c0_i32_1 = arith.constant 0 : i32
    return %c0_i32, %c0_i32_0 : i32, i32
  }
  func.func @transform_2(%arg0: i32) -> (i32, i32) {
    %c0_i32 = arith.constant 0 : i32
    %c0_i32_0 = arith.constant 0 : i32
    %c0_i32_1 = arith.constant 0 : i32
    return %c0_i32, %c0_i32_0 : i32, i32
  }
  func.func @transform_3(%arg0: i32) -> (i32, i32) {
    %c0_i32 = arith.constant 0 : i32
    %c0_i32_0 = arith.constant 0 : i32
    %c0_i32_1 = arith.constant 0 : i32
    return %c0_i32, %c0_i32_0 : i32, i32
  }
  func.func @transform_4(%arg0: i32) -> (i32, i32) {
    %c0_i32 = arith.constant 0 : i32
    %c0_i32_0 = arith.constant 0 : i32
    %c0_i32_1 = arith.constant 0 : i32
    return %c0_i32, %c0_i32_0 : i32, i32
  }
  func.func @transform_5(%arg0: i32) -> (i32, i32) {
    %c0_i32 = arith.constant 0 : i32
    %c0_i32_0 = arith.constant 0 : i32
    %c0_i32_1 = arith.constant 0 : i32
    return %c0_i32, %c0_i32_0 : i32, i32
  }
  func.func @transform_6(%arg0: i32) -> (i32, i32) {
    %c0_i32 = arith.constant 0 : i32
    %c0_i32_0 = arith.constant 0 : i32
    %c0_i32_1 = arith.constant 0 : i32
    return %c0_i32, %c0_i32_0 : i32, i32
  }
  func.func @transform_7(%arg0: i32) -> (i32, i32) {
    %c0_i32 = arith.constant 0 : i32
    %c0_i32_0 = arith.constant 0 : i32
    return %arg0, %c0_i32 : i32, i32
  }
}

</mosaic_0001>

<bundles_post_ra>
// kernel: tpu_custom_call.1
= control target key start
LH: loop header
LB: loop body
LE: loop exit
PB: predicated region body
PF: predicated region fallthrough
CT: control target
= control target key end

     0   :  { %12 = vsyncpa [#allocation3], 0  ;;  %s1732_s0 = inlined_call_operand.hbm [shape: f32[20,200], index: 0, kind: input, shape index: {}]   ;;  %s1733_s1 = inlined_call_operand.hbm [shape: bf16[200,128], index: 1, kind: input, shape index: {}]   ;;  %s1734_s2 = inlined_call_operand.vmem [shape: f32[1,128], index: 2, kind: input, shape index: {}]   ;;  %s1735_s3 = inlined_call_operand.vmem [shape: bf16[128,128], index: 3, kind: input, shape index: {}]   ;;  %s1736_s4 = inlined_call_operand.vmem [shape: f32[1,128], index: 4, kind: input, shape index: {}]   ;;  %s1737_s5 = inlined_call_operand.vmem [shape: bf16[128,8], index: 5, kind: input, shape index: {}]   ;;  %s1738_s6 = inlined_call_operand.vmem [shape: f32[1,8], index: 6, kind: input, shape index: {}]   ;;  %s1739_s7 = inlined_call_operand.vmem [shape: f32[20,8], index: 7, kind: output, shape index: {}]  }
   0x1   :  { %14 = vsyncpa [#allocation3 + $0x1], 0 }
   0x2   :  { %15 = vsyncpa [#allocation5], 0  ;;  %s1447_s24 = smov 0   ;;  %s1449_s25 = smov 0  }
   0x3   :  { %s1451_s26 = smov 0   ;;  %s1453_s27 = smov 0  }
   0x4 LB: > { %s1466_s28 = sadd.s32 4294967295, %s1364_s27   ;;  %s1469_s29 = sadd.s32 1, %s1364_s27   ;;  %s1364_s27 = sphi %s1453_s27, %s1757_s27   ;;  %s1360_s26 = sphi %s1451_s26, %s1756_s26   ;;  %s1356_s25 = sphi %s1449_s25, %s1755_s25   ;;  %s1352_s24 = sphi %s1447_s24, %s1754_s24  }
   0x5   : > { %s25_s30 = ssub.s32 %s1364_s27, %s1469_s29  ;;  %s28_s8 = sadd.s32 1, %s1360_s26 }
   0x6   : > { %p26_p0 = scmp.eq.s32.totalorder %s25_s30, 0  ;;  %p35_p1 = scmp.ne.s32.totalorder %s1360_s26, %s1356_s25 }
   0x7   : > { %p36_p2 = scmp.eq.s32.totalorder %s1364_s27, 0  ;;  %p41_p3 = scmp.ne.s32.totalorder %s1356_s25, %s1352_s24 }
   0x8   : > { %s1479_s9 = scalar_select %p26_p0, %s1360_s26, %s28_s8  }
   0x9   : > { %p1481_p4 = por %p36_p2, %p35_p1  ;;  %p1740_p5 = scmp.eq.s32.totalorder %s1466_s28, 0 }
   0xa   : > { %p191_p6 = scmp.eq.s32.totalorder %s1466_s28, 1  ;;  %p964_p7 = scmp.ge.s32.totalorder %s1364_s27, 1 }
   0xb   : > { %s1743_s10 = scalar_select %p1481_p4, 1, 0 }
   0xc   : > { %p1490_p8 = por %p1740_p5, %p41_p3  ;;  %p204_p9 = scmp.lt.s32.totalorder %s1364_s27, 3 }
   0xd   : > { %p1495_p10 = por %p191_p6, %p35_p1  ;;  %s1398_s14 = smov [#allocation4]  }
   0xe   : > { %s1744_s11 = scalar_select %p1490_p8, 1, 0 }
   0xf   : > { %s1745_s12 = scalar_select %p1495_p10, 1, 0 }
  0x10   : > { %p1499_p11 = pnand %p964_p7, %p204_p9  ;;  %s216_s15 = sshll.u32 %s1398_s14, 4  ;;  %s217_s15 = int_to_ptr.vmem [resolvable:$true] %s216_s15 }
  0x11   : > { %s1238_s19 = scalar_lea.hbm %s1733_s1, 1600 }
  0x12   : > { %s1746_s13 = scalar_select %p1499_p11, 1, 0 }
  0x13   : > { %p1099_p12 = pneg %p1499_p11  ;;  %p1239_p0 = scmp.ne.s32.totalorder %s1733_s1, %s1238_s19 }
  0x14   : > { %p1245_p6 = scmp.lt.u32.totalorder %s1238_s19, %s1733_s1 }
  0x15   : > { %p1507_p13 = pnand %p1099_p12, %p1740_p5 }
  0x17   : > { %p1240_p1 = pneg %p1507_p13 }
  0x19   : > { %p1241_p2 = pnand %p1240_p1, %p1239_p0 }
  0x1b   : > { %p1242_p3 = pneg %p1241_p2 }
  0x1d   : > { %p1247_p7 = pnand %p1245_p6, %p1242_p3 }
  0x1f   : > { %1250 = shalt.err (!%p1247_p7)
}
  0x20   : > { %s1251_s24 = scalar_lea.vmem %s217_s15, 1600  ;;  %p1259_p10 = scmp.lt.s32.totalorder %s217_s15, %s217_s15 }
  0x21   : > { %p1252_p9 = scmp.ne.s32.totalorder %s217_s15, %s1251_s24  ;;  %p1260_p8 = scmp.lt.s32.totalorder %s1251_s24, %s1251_s24 }
  0x23   : > { %p1254_p12 = pnand %p1252_p9, %p1240_p1  ;;  %p1261_p11 = por %p1260_p8, %p1259_p10 }
  0x25   : > { %p1255_p5 = pneg %p1254_p12 }
  0x27   : > { %p1262_p4 = pnand %p1261_p11, %p1255_p5 }
  0x29   : > { %1265 = shalt.err (!%p1262_p4)
}
  0x2a   : > { %s1399_s30 = smov 64   ;;  %s1400_s8 = smov 4  }
  0x2b   : > { %1102 = dma.hbm_to_vmem [thread:$0]  (!%p1507_p13), %s1733_s1, 1600, %s217_s15, [#allocation5], %s1399_s30, %s1399_s30, %s1400_s8  }
  0x2c   : > { %p966_p0 = scmp.ge.s32.totalorder %s1364_s27, 2 }
  0x2d   : > { %p1748_p2 = scmp.ne.s32.totalorder (!%p966_p0), %s1743_s10, 0 }
  0x2e   : > { %241 = sbr.rel (%p966_p0) target bundleno = 88 (0x58), region = 40 }
  0x35   : > { %244 = sbr.rel (!%p1748_p2) target bundleno = 88 (0x58), region = 44  ;;  %s245_s18 = sand.u32 (%p1748_p2), 1, %s1360_s26  }
  0x36   : > { %s968_s19 = sshll.u32 (%p1748_p2), %s1364_s27, 1  ;;  %s967_s20 = sshll.u32 (%p1748_p2), %s245_s18, 5 }
  0x37   : > { %s251_s21 = ssub.s32 (%p1748_p2), 3, %s968_s19  ;;  %s1535_s23 = scalar_lea.sflag (%p1748_p2), [#allocation3], %s245_s18 }
  0x38   : > { %p252_p4 = scmp.lt.s32.totalorder (%p1748_p2), %s251_s21, 2  ;;  %s249_s15 = scalar_lea.vmem (%p1748_p2), [#allocation2], %s967_s20 }
  0x3c   : > { %s1759_s21 = smov (!%p252_p4, %s251_s21), 2 }
  0x3d   : > { %s1532_s22 = sshll.u32 %s1759_s21, 8 }
  0x3e   : > { %s257_s16 = ssub.s32 512, %s1532_s22 }
  0x3f   : > { %258 = vsyncadd %s1535_s23, %s257_s16  ;;  %p971_p5 = scmp.ne.s32.totalorder %s1532_s22, 0  ;;  %s1032_s10 = sshll.u32 %s1364_s27, 9 }
  0x40   : > { %s1543_s8 = scalar_lea.hbm %s1732_s0, %s1032_s10  ;;  %s264_s14 = sshll.u32 %s249_s15, 4  ;;  %s1545_s14 = int_to_ptr.vmem [resolvable:$true] %s264_s14 }
  0x41   : > { %s1266_s17 = scalar_lea.hbm %s1543_s8, %s1532_s22  ;;  %s1270_s27 = scalar_lea.hbm %s1732_s0, 768 }
  0x42   : > { %p1267_p8 = scmp.ne.s32.totalorder %s1543_s8, %s1266_s17  ;;  %p1271_p13 = scmp.lt.u32.totalorder %s1543_s8, %s1732_s0 }
  0x43   : > { %p1272_p1 = scmp.lt.u32.totalorder %s1270_s27, %s1266_s17  ;;  %p1274_p6 = scmp.lt.u32.totalorder %s1266_s17, %s1543_s8 }
  0x44   : > { %p1268_p10 = pnand %p1267_p8, %p971_p5 }
  0x45   : > { %p1273_p3 = por %p1272_p1, %p1271_p13 }
  0x46   : > { %p1269_p11 = pneg %p1268_p10 }
  0x47   : > { %p1275_p7 = por %p1274_p6, %p1273_p3 }
  0x49   : > { %p1276_p9 = pnand %p1275_p7, %p1269_p11 }
  0x4b   : > { %1279 = shalt.err (!%p1276_p9)
}
  0x4c   : > { %s1280_s16 = scalar_lea.vmem %s1545_s14, %s1532_s22  ;;  %s1401_s15 = smov [#allocation2]  }
  0x4d   : > { %p1281_p12 = scmp.ne.s32.totalorder %s1545_s14, %s1280_s16  ;;  %s1284_s10 = sshll.u32 %s1401_s15, 4  ;;  %s1285_s10 = int_to_ptr.vmem [resolvable:$false] %s1284_s10 }
  0x4e   : > { %s1286_s24 = scalar_lea.vmem %s1285_s10, 1024  ;;  %p1287_p4 = scmp.lt.s32.totalorder %s1545_s14, %s1285_s10 }
  0x4f   : > { %p1282_p0 = pnand %p1281_p12, %p971_p5  ;;  %p1288_p8 = scmp.lt.s32.totalorder %s1286_s24, %s1280_s16 }
  0x51   : > { %p1283_p2 = pneg %p1282_p0  ;;  %p1289_p10 = por %p1288_p8, %p1287_p4 }
  0x53   : > { %p1290_p13 = pnand %p1289_p10, %p1283_p2 }
  0x55   : > { %1293 = shalt.err (!%p1290_p13)
}
  0x56   : > { %s1402_s30 = smov 256   ;;  %s1403_s17 = smov 16  }
  0x57   : > { %270 = dma.hbm_to_vmem [thread:$0]  (%p971_p5), %s1543_s8, %s1532_s22, %s1545_s14, %s1535_s23, %s1402_s30, %s1402_s30, %s1403_s17  }
  0x58 PF: > { %p1749_p11 = scmp.ne.s32.totalorder %s1746_s13, 0 }
  0x59   : > { %s1575_s18 = sand.u32 (!%p1749_p11), 1, %s1356_s25   ;;  %p1750_p1 = scmp.ne.s32.totalorder (!%p1749_p11), %s1744_s11, 0 }
  0x5a   : > { %276 = sbr.rel (%p1749_p11) target bundleno = 860 (0x35c), region = 48  ;;  %s977_s19 = sshll.u32 (!%p1749_p11), %s1575_s18, 5 }
  0x5b   : > { %s279_s27 = scalar_lea.sflag (!%p1749_p11), [#allocation3], %s1575_s18  ;;  %s1579_s20 = scalar_lea.vmem (!%p1749_p11), [#allocation2], %s977_s19 }
  0x61   : > { %1343 = dma.done.wait (%p1750_p1), %s279_s27, 512  }
  0x62   : > { %1345 = vsyncadd (%p1750_p1), %s279_s27, 4294966784  ;;  %p1751_p5 = scmp.eq.s32.totalorder %s1466_s28, 0 }
  0x64   : > { %1347 = dma.done.wait (%p1751_p5), [#allocation5], 1600   ;;  %p1752_p3 = pmov %p1751_p5 }
  0x65   : > { %v1404_v0 = vmov 0   ;;  %v1405_v1 = vmov 0.0   ;;  %v1209_v2 = vld [vmem:[#allocation4] sm:$0xff]   ;;  %v1210_v3 = vld [vmem:[#allocation4 + $0x8] sm:$0xff]   ;;  %v1211_v4 = vld [vmem:[#allocation4 + $0x10] sm:$0xff]   ;;  %vm441_vm0 = vcmask 588800  }
  0x66   : > { %1349 = vsyncadd (%p1752_p3), [#allocation5], 4294965696  ;;  %449 = vmatprep.subr.bf16.mxu0 %v1404_v0  ;;  %1054 = vmatprep.subr.bf16.mxu1 %v1405_v1  ;;  %v1212_v5 = vld [vmem:[#allocation4 + $0x18] sm:$0xff]   ;;  %v329_v6 = vld [vmem:[%s1579_s20 + $0x8] sm:$0xff]  ;;  %vm445_vm1 = vcmask 1043456   ;;  %vm1406_vm2 = vmmov 0  }
  0x67   : > { %450 = vmatpush1.bf16.msra.mxu0 %v1209_v2  ;;  %v1213_v7 = vld [vmem:[#allocation4 + $0x20] sm:$0xff]   ;;  %v331_v8 = vld [vmem:[%s1579_s20 + $0x18] sm:$0xff]  ;;  %v1223_v11 = vld [vmem:[%s1735_s3 + $0x8] sm:$0xff]   ;;  %1070 = vmatprep.mubr.msk.bf16.mxu1 %vm1406_vm2, %v1405_v1  ;;  %s979_s8 = sshll.u32 %s1575_s18, 4  ;;  %vm720_vm3 = vcmask 64512   ;;  %p1753_p6 = scmp.ne.s32.totalorder %s1745_s12, 0 }
  0x68   : > { %451 = vmatprep.subr.bf16.mxu0 %v1404_v0  ;;  %v333_v9 = vpack.c.bf16 %v331_v8, %v329_v6  ;;  %v1222_v10 = vld [vmem:[%s1735_s3] sm:$0xff]   ;;  %v1214_v12 = vld [vmem:[#allocation4 + $0x28] sm:$0xff]   ;;  %v1215_v13 = vld [vmem:[#allocation4 + $0x30] sm:$0xff]   ;;  %s1684_s16 = scalar_lea.vmem [#allocation6], %s979_s8   ;;  %s1014_s18 = sshll.u32 (%p1753_p6), %s1466_s28, 1 }
  0x69   : > { %1055 = vmatpush3.bf16.msra.mxu1 %v1222_v10  ;;  %v1224_v14 = vld [vmem:[%s1735_s3 + $0x10] sm:$0xff]   ;;  %v1225_v15 = vld [vmem:[%s1735_s3 + $0x18] sm:$0xff]   ;;  %v1226_v17 = vld [vmem:[%s1735_s3 + $0x20] sm:$0xff]   ;;  %s1033_s15 = sshll.u32 (%p1753_p6), %s1466_s28, 4  ;;  %s731_s10 = ssub.s32 (%p1753_p6), 3, %s1014_s18 }
  0x6a   : > { %994 = vmatprep.mubr.msk.bf16.mxu0 %vm441_vm0, %v333_v9  ;;  %1056 = vmatprep.subr.bf16.mxu1 %v1405_v1  ;;  %v1216_v16 = vld [vmem:[#allocation4 + $0x38] sm:$0xff]   ;;  %v1217_v18 = vld [vmem:[#allocation4 + $0x40] sm:$0xff]   ;;  %v1227_v19 = vld [vmem:[%s1735_s3 + $0x28] sm:$0xff]   ;;  %s1695_s17 = scalar_lea.vmem (%p1753_p6), %s1739_s7, %s1033_s15   ;;  %p732_p7 = scmp.lt.s32.totalorder (%p1753_p6), %s731_s10, 2 }
  0x6b   : > { %452 = vmatpush1.bf16.msra.mxu0 %v1210_v3  ;;  %v1218_v20 = vld [vmem:[#allocation4 + $0x48] sm:$0xff]   ;;  %v1219_v21 = vld [vmem:[#allocation4 + $0x50] sm:$0xff]   ;;  %v1220_v22 = vld [vmem:[#allocation4 + $0x58] sm:$0xff]  }
  0x6c   : > { %453 = vmatprep.subr.bf16.mxu0 %v1404_v0  ;;  %v1221_v23 = vld [vmem:[#allocation4 + $0x60] ss:$0 sps:$4 sm:$0xff]   ;;  %v330_v25 = vld [vmem:[%s1579_s20 + $0x10] sm:$0xff]  ;;  %v1229_v29 = vld [vmem:[%s1735_s3 + $0x38] sm:$0xff]  }
  0x6d   : > { %1057 = vmatpush3.bf16.msra.mxu1 %v1223_v11  ;;  %v328_v24 = vld [vmem:[%s1579_s20] sm:$0xff]  ;;  %v447_v26 = vsel %vm445_vm1, %v1221_v23, 0  ;;  %v1228_v28 = vld [vmem:[%s1735_s3 + $0x30] sm:$0xff]   ;;  %v1231_v41 = vld [vmem:[%s1737_s5 + $0x8] sm:$0xff]  }
  0x6e   : > { %1058 = vmatprep.subr.bf16.mxu1 %v1405_v1  ;;  %v332_v27 = vpack.c.bf16 %v330_v25, %v328_v24  ;;  %v980_v30 = vld [vmem:[%s1734_s2] ss:$0 sm:$0xff]  ;;  %v1232_v42 = vld [vmem:[%s1737_s5 + $0x10] sm:$0xff]   ;;  %v1233_v43 = vld [vmem:[%s1737_s5 + $0x18] sm:$0xff]  }
  0x6f   : > { %454 = vmatpush1.bf16.msra.mxu0 %v1211_v4  ;;  %v1230_v39 = vld [vmem:[%s1737_s5] sm:$0xff]   ;;  %v1235_v45 = vld [vmem:[%s1737_s5 + $0x28] sm:$0xff]   ;;  %v1236_v46 = vld [vmem:[%s1737_s5 + $0x30] sm:$0xff]  }
  0x70   : > { %455 = vmatprep.subr.bf16.mxu0 %v1404_v0  ;;  %v1234_v44 = vld [vmem:[%s1737_s5 + $0x20] sm:$0xff]   ;;  %v1237_v47 = vld [vmem:[%s1737_s5 + $0x38] sm:$0xff]  }
  0x71   : > { %1059 = vmatpush3.bf16.msra.mxu1 %v1224_v14  ;;  %v995_v48 = vld [vmem:[%s1736_s4] ss:$0 sm:$0xff] }
  0x72   : > { %1060 = vmatprep.subr.bf16.mxu1 %v1405_v1  ;;  %v1004_v58 = vld [vmem:[%s1738_s6] ss:$0 sm:$0xff] }
  0x73   : > { %456 = vmatpush1.bf16.msra.mxu0 %v1212_v5 }
  0x74   : > { %457 = vmatprep.subr.bf16.mxu0 %v1404_v0 }
  0x75   : > { %1061 = vmatpush3.bf16.msra.mxu1 %v1225_v15 }
  0x76   : > { %1062 = vmatprep.subr.bf16.mxu1 %v1405_v1 }
  0x77   : > { %458 = vmatpush1.bf16.msra.mxu0 %v1213_v7 }
  0x78   : > { %459 = vmatprep.subr.bf16.mxu0 %v1404_v0 }
  0x79   : > { %1063 = vmatpush3.bf16.msra.mxu1 %v1226_v17 }
  0x7a   : > { %1064 = vmatprep.subr.bf16.mxu1 %v1405_v1 }
  0x7b   : > { %460 = vmatpush1.bf16.msra.mxu0 %v1214_v12 }
  0x7c   : > { %461 = vmatprep.subr.bf16.mxu0 %v1404_v0 }
  0x7d   : > { %1065 = vmatpush3.bf16.msra.mxu1 %v1227_v19 }
  0x7e   : > { %1066 = vmatprep.subr.bf16.mxu1 %v1405_v1 }
  0x7f   : > { %462 = vmatpush1.bf16.msra.mxu0 %v1215_v13 }
  0x80   : > { %463 = vmatprep.subr.bf16.mxu0 %v1404_v0 }
  0x81   : > { %1067 = vmatpush3.bf16.msra.mxu1 %v1228_v28 }
  0x82   : > { %1068 = vmatprep.subr.bf16.mxu1 %v1405_v1 }
  0x83   : > { %464 = vmatpush1.bf16.msra.mxu0 %v1216_v16 }
  0x84   : > { %465 = vmatprep.subr.bf16.mxu0 %v1404_v0 }
  0x85   : > { %1069 = vmatpush3.bf16.msra.mxu1 %v1229_v29 }
  0x86   : > { %1074 = vmatprep.subr.bf16.mxu1 %v1405_v1 }
  0x87   : > { %466 = vmatpush1.bf16.msra.mxu0 %v1217_v18 }
  0x88   : > { %467 = vmatprep.subr.bf16.mxu0 %v1404_v0 }
  0x8b   : > { %468 = vmatpush1.bf16.msra.mxu0 %v1218_v20 }
  0x8c   : > { %469 = vmatprep.subr.bf16.mxu0 %v1404_v0 }
  0x8f   : > { %470 = vmatpush1.bf16.msra.mxu0 %v1219_v21 }
  0x90   : > { %471 = vmatprep.subr.bf16.mxu0 %v1404_v0 }
  0x93   : > { %472 = vmatpush1.bf16.msra.mxu0 %v1220_v22 }
  0x94   : > { %473 = vmatprep.subr.bf16.mxu0 %v1404_v0 }
  0x97   : > { %474 = vmatpush1.bf16.msra.mxu0 %v447_v26 }
  0x9a   : > { %482 = vmatmul.mubr.bf16.vlgmr.msra.gmra.mrb[0].mxu0 %v332_v27 }
 0x16d   : > { %v483_v31 = vpop.f32.mrb[0].mxu0 }
 0x16e   : > { %v484_v32 = vadd.f32 %v980_v30, %v483_v31  ;;  %v485_v33 = vpop.f32.mrb[1].mxu0 }
 0x16f   : > { %v486_v34 = vpop.f32.mrb[2].mxu0 }
 0x170   : > { %v487_v35 = vadd.f32 %v980_v30, %v486_v34  ;;  %v488_v36 = vpop.f32.mrb[3].mxu0  ;;  %v490_v37 = vmax.f32 %v484_v32, 0.0 }
 0x172   : > { %v491_v38 = vmax.f32 %v487_v35, 0.0 }
 0x174   : > { %v492_v40 = vpack.c.bf16 %v491_v38, %v490_v37 }
 0x176   : > { %1071 = vmatmul.mubr.bf16.vlgmr.msra.gmra.mrb[0].mxu1 %v492_v40 }
 0x177   : > { %1075 = vmatpush3.bf16.msra.mxu1 %v1230_v39  ;;  %1090 = vmatprep.mubr.msk.bf16.mxu1 %vm1406_vm2, %v1405_v1 }
 0x178   : > { %1076 = vmatprep.subr.bf16.mxu1 %v1405_v1 }
 0x17b   : > { %1077 = vmatpush3.bf16.msra.mxu1 %v1231_v41 }
 0x17c   : > { %1078 = vmatprep.subr.bf16.mxu1 %v1405_v1 }
 0x17f   : > { %1079 = vmatpush3.bf16.msra.mxu1 %v1232_v42 }
 0x180   : > { %1080 = vmatprep.subr.bf16.mxu1 %v1405_v1 }
 0x183   : > { %1081 = vmatpush3.bf16.msra.mxu1 %v1233_v43 }
 0x184   : > { %1082 = vmatprep.subr.bf16.mxu1 %v1405_v1 }
 0x187   : > { %1083 = vmatpush3.bf16.msra.mxu1 %v1234_v44 }
 0x188   : > { %1084 = vmatprep.subr.bf16.mxu1 %v1405_v1 }
 0x18b   : > { %1085 = vmatpush3.bf16.msra.mxu1 %v1235_v45 }
 0x18c   : > { %1086 = vmatprep.subr.bf16.mxu1 %v1405_v1 }
 0x18f   : > { %1087 = vmatpush3.bf16.msra.mxu1 %v1236_v46 }
 0x190   : > { %1088 = vmatprep.subr.bf16.mxu1 %v1405_v1 }
 0x193   : > { %1089 = vmatpush3.bf16.msra.mxu1 %v1237_v47 }
 0x249   : > { %v598_v49 = vpop.f32.mrb[0].mxu1 }
 0x24a   : > { %v599_v50 = vadd.f32 %v995_v48, %v598_v49  ;;  %v1072_v51 = vpop.f32.mrb[1].mxu1 }
 0x24b   : > { %v601_v52 = vpop.f32.mrb[2].mxu1 }
 0x24c   : > { %v602_v53 = vadd.f32 %v995_v48, %v601_v52  ;;  %v1073_v54 = vpop.f32.mrb[3].mxu1  ;;  %v605_v55 = vmax.f32 %v599_v50, 0.0 }
 0x24e   : > { %v606_v56 = vmax.f32 %v602_v53, 0.0 }
 0x250   : > { %v607_v57 = vpack.c.bf16 %v606_v56, %v605_v55 }
 0x252   : > { %1091 = vmatmul.mubr.bf16.vlgmr.msra.gmra.mrb[4].mxu1 %v607_v57 }
 0x324   : > { %729 = sbr.rel (!%p1753_p6) target bundleno = 860 (0x35c), region = 60 }
 0x325   : > { %v713_v59 = vpop.f32.mrb[4].mxu1 }
 0x326   : > { %v714_v60 = vadd.f32 %v1004_v58, %v713_v59  ;;  %v1092_v61 = vpop.f32.mrb[5].mxu1 }
 0x327   : > { %v716_v62 = vpop.f32.mrb[6].mxu1 }
 0x328   : > { %721 = vst.msk [vmem:[%s1684_s16] sm:$0xff] %vm720_vm3, %v714_v60  ;;  %v717_v63 = vadd.f32 %v1004_v58, %v716_v62  ;;  %v1093_v0 = vpop.f32.mrb[7].mxu1 }
 0x32a   : > { %722 = vst.msk [vmem:[%s1684_s16 + $0x8] sm:$0xff] %vm720_vm3, %v717_v63 }
 0x32b   : > { %s1761_s10 = smov (!%p732_p7, %s731_s10), 2 }
 0x32c   : > { %s1015_s19 = sshll.u32 %s1761_s10, 7 }
 0x32d   : > { %p1018_p9 = scmp.eq.s32.totalorder %s1015_s19, 0 }
 0x32e   : > { %s1701_s12 = sshrl.u32 (!%p1018_p9), %s1761_s10, 1 }
 0x32f   : > { %740 = sbr.rel (%p1018_p9) target bundleno = 860 (0x35c), region = 64  ;;  %p1019_p12 = scmp.le.s32.totalorder (!%p1018_p9), %s1701_s12, 0 }
 0x336   : > { %907 = sbr.rel (%p1019_p12) target bundleno = 839 (0x347), region = 146  ;;  %s1366_s28 = smov (!%p1019_p12), %s1695_s17  }
 0x337   : > { %s1370_s27 = smov (!%p1019_p12), %s1684_s16   ;;  %s1374_s11 = smov (!%p1019_p12), 0  }
 0x338   : > { %s1378_s20 = smov (!%p1019_p12), 0  }
 0x33d LB: >> { %v804_v1 = vld [vmem:[%s1372_s27] sm:$0xff]  ;;  %v806_v2 = vld [vmem:[%s1372_s27 + $0x8] sm:$0xff]  ;;  %s808_s13 = sadd.s32 1, %s1376_s11  ;;  %s798_s20 = sadd.s32 1, %s1380_s20   ;;  %s1380_s20 = sphi %s1378_s20, %s798_s20   ;;  %s1376_s11 = sphi %s1374_s11, %s1375_s11   ;;  %s1372_s27 = sphi %s1370_s27, %s813_s27   ;;  %s1368_s28 = sphi %s1366_s28, %s814_s28  }
 0x33e   : >> { %805 = vst [vmem:[%s1368_s28] sm:$0xff] %v804_v1  ;;  %807 = vst [vmem:[%s1368_s28 + $0x8] sm:$0xff] %v806_v2  ;;  %p809_p0 = scmp.ge.s32.totalorder %s808_s13, %s1701_s12  ;;  %p797_p2 = scmp.ge.s32.totalorder %s798_s20, %s1701_s12 }
 0x340   : >> { %s1763_s13 = smov (%p809_p0, %s808_s13), 0  ;;  %800 = sbr.rel (!%p797_p2) target bundleno = 829 (0x33d), region = 152 }
 0x341   : >> { %s1020_s22 = sshll.u32 %s1763_s13, 4  ;;  %s1375_s11 = smov %s1763_s13  }
 0x342   : >> { %s813_s27 = scalar_lea.vmem %s1684_s16, %s1020_s22 [#allocation6]   ;;  %s814_s28 = scalar_lea.vmem %s1695_s17, %s1020_s22  }
 0x347 PF: > { %s1711_s23 = sand.u32 1, %s1761_s10   ;;  %s1034_s8 = sshll.u32 %s1701_s12, 4 }
 0x348   : > { %s819_s14 = scalar_lea.vmem %s1684_s16, %s1034_s8 [#allocation6]   ;;  %s821_s21 = scalar_lea.vmem %s1695_s17, %s1034_s8  }
 0x349   : > { %p1025_p4 = scmp.le.s32.totalorder %s1711_s23, 0 }
 0x34a   : > { %s1382_s18 = smov (!%p1025_p4), %s821_s21   ;;  %s1386_s15 = smov (!%p1025_p4), %s819_s14  }
 0x34b   : > { %921 = sbr.rel (%p1025_p4) target bundleno = 860 (0x35c), region = 157  ;;  %s1390_s24 = smov (!%p1025_p4), 0  }
 0x34c   : > { %s1394_s30 = smov (!%p1025_p4), 0  }
 0x352 LB: >> { %v831_v3 = vld [vmem:[%s1388_s15] sm:$0xff]  ;;  %s833_s10 = sadd.s32 1, %s1392_s24  ;;  %s825_s30 = sadd.s32 1, %s1396_s30   ;;  %s1396_s30 = sphi %s1394_s30, %s825_s30   ;;  %s1392_s24 = sphi %s1390_s24, %s1391_s24   ;;  %s1388_s15 = sphi %s1386_s15, %s838_s15   ;;  %s1384_s18 = sphi %s1382_s18, %s839_s18  }
 0x353   : >> { %832 = vst [vmem:[%s1384_s18] sm:$0xff] %v831_v3  ;;  %p834_p8 = scmp.ge.s32.totalorder %s833_s10, %s1711_s23  ;;  %p824_p10 = scmp.ge.s32.totalorder %s825_s30, %s1711_s23 }
 0x355   : >> { %s1765_s10 = smov (%p834_p8, %s833_s10), 0  ;;  %827 = sbr.rel (!%p824_p10) target bundleno = 850 (0x352), region = 163 }
 0x356   : >> { %s1026_s16 = sshll.u32 %s1765_s10, 3  ;;  %s1391_s24 = smov %s1765_s10  }
 0x357   : >> { %s838_s15 = scalar_lea.vmem %s819_s14, %s1026_s16 [#allocation6]   ;;  %s839_s18 = scalar_lea.vmem %s821_s21, %s1026_s16  }
 0x35c PF: > { %p18_p13 = scmp.ge.s32.totalorder %s1469_s29, 4   ;;  %s1754_s24 = smov %s1356_s25 }
 0x35d   : > { %s1755_s25 = smov %s1360_s26  ;;  %s1756_s26 = smov %s1479_s9 }
 0x35e   : > { %s1757_s27 = smov %s1469_s29  ;;  %20 = sbr.rel (!%p18_p13) target bundleno = 4 (0x4), region = 174 }
 0x365   :  { %855 = vsyncpa [#allocation3], 1 }
 0x366   :  { %857 = vsyncpa [#allocation3 + $0x1], 1 }
 0x367   :  { %858 = vsyncpa [#allocation5], 1 }

</bundles_post_ra>
